<compile_context>
chip_gen: v6e
topology: v6e:2x2x1
jax: 0.10.0
libtpu: 0.0.40
codegen_flags: <defaults>
</compile_context>

<pallas_src>
import jax
import jax.numpy as jnp
from jax.experimental import pallas as pl
from jax.experimental.pallas import tpu as pltpu

LANE = 128
SUBLANE = 8


def _round_up(n, m):
    return ((n + m - 1) // m) * m


def _cdiv(a, b):
    return -(-a // b)


def _choose_tiles(B, max_tile):
    """Pick (ntiles, TB, B_pad) so that padding <= 7 rows/tile and, for batches
    big enough to split, there are >= 2 grid steps (v7x megacore sharding)."""
    ntiles = max(1, _cdiv(B, max_tile))
    if B >= 2 * SUBLANE:
        ntiles = max(ntiles, 2)
    TB = _round_up(_cdiv(B, ntiles), SUBLANE)
    B_pad = ntiles * TB
    return ntiles, TB, B_pad


def _make_kernel(hp, zp, xp):
    """Kernel closure over the padded layer widths (static lane-aligned slices)."""

    def kernel(x_ref, w1_ref, w2_ref, w3_ref, w4_ref, b_ref, out_ref):
        # x_ref is f32 (TB, x_dim); cast to bf16 only as an MXU operand so the
        # HBM x stream stays at the true (unpadded) width with no wrapper pass.
        xb = x_ref[...].astype(jnp.bfloat16)
        h = jnp.dot(xb, w1_ref[...], preferred_element_type=jnp.float32)
        h = jnp.maximum(h + b_ref[0:1, :hp], 0.0)

        z = jnp.dot(h.astype(jnp.bfloat16), w2_ref[...],
                    preferred_element_type=jnp.float32)
        z = jnp.maximum(z + b_ref[1:2, :zp], 0.0)

        d = jnp.dot(z.astype(jnp.bfloat16), w3_ref[...],
                    preferred_element_type=jnp.float32)
        d = jnp.maximum(d + b_ref[2:3, :hp], 0.0)

        o = jnp.dot(d.astype(jnp.bfloat16), w4_ref[...],
                    preferred_element_type=jnp.float32)
        # Lane-dense (128-wide) store; bf16 halves writeback bytes.
        out_ref[...] = jnp.maximum(o + b_ref[3:4, :xp], 0.0).astype(out_ref.dtype)

    return kernel


def init_params(key, x_dim, hidden_dim, z_dim):
    """Deterministic init. Weights stored as (in, out) = PyTorch weight.T, f32."""
    ks = jax.random.split(key, 8)

    def linear(kw, kb, fan_in, fan_out):
        # mimic PyTorch nn.Linear default: U(-1/sqrt(fan_in), 1/sqrt(fan_in))
        bound = 1.0 / jnp.sqrt(fan_in)
        w = jax.random.uniform(kw, (fan_in, fan_out), jnp.float32, -bound, bound)
        b = jax.random.uniform(kb, (1, fan_out), jnp.float32, -bound, bound)
        return w, b

    w1, b1 = linear(ks[0], ks[1], x_dim, hidden_dim)
    w2, b2 = linear(ks[2], ks[3], hidden_dim, z_dim)
    w3, b3 = linear(ks[4], ks[5], z_dim, hidden_dim)
    w4, b4 = linear(ks[6], ks[7], hidden_dim, x_dim)
    return {"w1": w1, "b1": b1, "w2": w2, "b2": b2,
            "w3": w3, "b3": b3, "w4": w4, "b4": b4}


def pack_params(params, x_dim, hidden_dim, z_dim, weight_dtype=jnp.bfloat16):
    """Zero-pad layer *output* widths to multiples of 128, cast weights to
    bf16, and pack the 4 biases into one lane-aligned f32 array. w1 keeps its
    true input width (x_dim) so x can be streamed unpadded."""
    xp = _round_up(x_dim, LANE)
    hp = _round_up(hidden_dim, LANE)
    zp = _round_up(z_dim, LANE)
    dmax = max(xp, hp, zp)

    def pad_w(w, rows, cols):
        out = jnp.zeros((rows, cols), weight_dtype)
        return out.at[: w.shape[0], : w.shape[1]].set(w.astype(weight_dtype))

    b = jnp.zeros((SUBLANE, dmax), jnp.float32)      # 8 rows = sublane-friendly
    b = b.at[0, :hidden_dim].set(params["b1"].reshape(-1))
    b = b.at[1, :z_dim].set(params["b2"].reshape(-1))
    b = b.at[2, :hidden_dim].set(params["b3"].reshape(-1))
    b = b.at[3, :x_dim].set(params["b4"].reshape(-1))

    return {
        "w1": pad_w(params["w1"], x_dim, hp),   # (x_dim, hp): true K, padded N
        "w2": pad_w(params["w2"], hp, zp),
        "w3": pad_w(params["w3"], zp, hp),
        "w4": pad_w(params["w4"], hp, xp),
        "b": b,
        "dims": (x_dim, hidden_dim, z_dim, xp, hp, zp, dmax),
    }


def autoencoder_forward(x, packed, *, max_tile=1024, out_dtype=jnp.bfloat16):
    """x: (B, x_dim) float32. packed: output of pack_params. Returns (B, x_dim)."""
    x_dim, hidden_dim, z_dim, xp, hp, zp, dmax = packed["dims"]
    B = x.shape[0]

    ntiles, TB, B_pad = _choose_tiles(B, max_tile)

    # Only pad the batch axis, and only when the tile split requires it.
    x_in = x
    if B_pad != B:
        x_in = jnp.zeros((B_pad, x_dim), x.dtype).at[:B].set(x)

    out_pad = pl.pallas_call(
        _make_kernel(hp, zp, xp),
        out_shape=jax.ShapeDtypeStruct((B_pad, xp), out_dtype),
        grid=(ntiles,),
        in_specs=[
            pl.BlockSpec((TB, x_dim), lambda i: (i, 0)),  # x tile: pipelined per step
            pl.BlockSpec((x_dim, hp), lambda i: (0, 0)),  # weights: constant index_map
            pl.BlockSpec((hp, zp), lambda i: (0, 0)),     #   -> stay VMEM-resident
            pl.BlockSpec((zp, hp), lambda i: (0, 0)),
            pl.BlockSpec((hp, xp), lambda i: (0, 0)),
            pl.BlockSpec((SUBLANE, dmax), lambda i: (0, 0)),  # packed biases (1 DMA)
        ],
        out_specs=pl.BlockSpec((TB, xp), lambda i: (i, 0)),
        compiler_params=pltpu.CompilerParams(
            dimension_semantics=("parallel",),            # megacore-shard the batch
            vmem_limit_bytes=32 * 1024 * 1024,
        ),
    )(x_in, packed["w1"], packed["w2"], packed["w3"], packed["w4"], packed["b"])

    # TODO(synk): consumers that can accept the padded (B_pad, xp) bf16 slab
    # should skip this slice (it is one extra XLA pass over the output).
    return out_pad[:B, :x_dim]


def reference_forward_f32(x, p):
    """Pure f32 reference matching the PyTorch module."""
    h = jnp.maximum(x @ p["w1"] + p["b1"], 0.0)
    z = jnp.maximum(h @ p["w2"] + p["b2"], 0.0)
    d = jnp.maximum(z @ p["w3"] + p["b3"], 0.0)
    return jnp.maximum(d @ p["w4"] + p["b4"], 0.0)


def reference_forward_matched(x, packed, out_dtype=jnp.bfloat16):
    """Same bf16-operand / f32-accumulate math as the kernel, in plain XLA."""
    x_dim, hidden_dim, z_dim, xp, hp, zp, dmax = packed["dims"]
    b = packed["b"]
    xb = x.astype(jnp.bfloat16)
    h = jnp.maximum(jnp.dot(xb, packed["w1"],
                            preferred_element_type=jnp.float32) + b[0:1, :hp], 0.0)
    z = jnp.maximum(jnp.dot(h.astype(jnp.bfloat16), packed["w2"],
                            preferred_element_type=jnp.float32) + b[1:2, :zp], 0.0)
    d = jnp.maximum(jnp.dot(z.astype(jnp.bfloat16), packed["w3"],
                            preferred_element_type=jnp.float32) + b[2:3, :hp], 0.0)
    o = jnp.maximum(jnp.dot(d.astype(jnp.bfloat16), packed["w4"],
                            preferred_element_type=jnp.float32) + b[3:4, :xp], 0.0)
    return o.astype(out_dtype)[:, :x_dim]


if __name__ == "__main__":
    # Small shapes consistent with the module: x_dim=64, hidden_dim=32, z_dim=10.
    batch, x_dim, hidden_dim, z_dim = 8, 64, 32, 10

    key = jax.random.PRNGKey(0)
    k_x, k_p = jax.random.split(key)
    x = jax.random.normal(k_x, (batch, x_dim), jnp.float32)
    params = init_params(k_p, x_dim, hidden_dim, z_dim)
    packed = pack_params(params, x_dim, hidden_dim, z_dim)

    out = autoencoder_forward(x, packed)
    out = jax.block_until_ready(out)
    assert out.shape == (batch, x_dim), out.shape
    assert out.dtype == jnp.bfloat16, out.dtype

    # Tight check vs. an XLA reference using identical bf16/f32 mixed precision.
    ref_matched = reference_forward_matched(x, packed)
    assert jnp.allclose(out.astype(jnp.float32), ref_matched.astype(jnp.float32),
                        atol=1e-2, rtol=1e-2), \
        "mismatch vs matched-precision reference"

    # Loose sanity check vs. the pure-f32 PyTorch-equivalent math.
    ref_f32 = reference_forward_f32(x, params)
    assert jnp.allclose(out.astype(jnp.float32), ref_f32, atol=5e-2, rtol=5e-2), \
        "mismatch vs f32 reference"

    # Exercise the multi-tile / batch-padding / >=2-grid-step (megacore) path.
    B2 = 300
    x2 = jax.random.normal(jax.random.PRNGKey(1), (B2, x_dim), jnp.float32)
    out2 = jax.block_until_ready(autoencoder_forward(x2, packed))
    ref2 = reference_forward_matched(x2, packed)
    assert out2.shape == (B2, x_dim), out2.shape
    assert jnp.allclose(out2.astype(jnp.float32), ref2.astype(jnp.float32),
                        atol=1e-2, rtol=1e-2), \
        "mismatch vs matched-precision reference (multi-tile path)"

    print("KERNEL_OK")
</pallas_src>

<mosaic_0001>
module attributes {stable_mosaic.version = 11 : i64} {
  func.func @kernel(%arg0: i32, %arg1: memref<8x64xf32, #tpu.memory_space<vmem>>, %arg2: memref<64x128xbf16, #tpu.memory_space<vmem>>, %arg3: memref<128x128xbf16, #tpu.memory_space<vmem>>, %arg4: memref<128x128xbf16, #tpu.memory_space<vmem>>, %arg5: memref<128x128xbf16, #tpu.memory_space<vmem>>, %arg6: memref<8x128xf32, #tpu.memory_space<vmem>>, %arg7: memref<8x128xbf16, #tpu.memory_space<vmem>>) attributes {dimension_semantics = [#tpu.dimension_semantics<parallel>], iteration_bounds = array<i64: 1>, scalar_prefetch = 0 : i64, scratch_operands = 0 : i64, tpu.core_type = #tpu.core_type<tc>, window_params = [{transform_indices = @transform_0, window_bounds = array<i64: 8, 64>}, {pipeline_mode = #tpu.pipeline_mode<synchronous>, transform_indices = @transform_1, window_bounds = array<i64: 64, 128>}, {pipeline_mode = #tpu.pipeline_mode<synchronous>, transform_indices = @transform_2, window_bounds = array<i64: 128, 128>}, {pipeline_mode = #tpu.pipeline_mode<synchronous>, transform_indices = @transform_3, window_bounds = array<i64: 128, 128>}, {pipeline_mode = #tpu.pipeline_mode<synchronous>, transform_indices = @transform_4, window_bounds = array<i64: 128, 128>}, {pipeline_mode = #tpu.pipeline_mode<synchronous>, transform_indices = @transform_5, window_bounds = array<i64: 8, 128>}, {transform_indices = @transform_6, window_bounds = array<i64: 8, 128>}]} {
    %c0 = arith.constant 0 : index
    %c0_0 = arith.constant 0 : index
    %0 = vector.load %arg1[%c0, %c0_0] : memref<8x64xf32, #tpu.memory_space<vmem>>, vector<8x64xf32>
    %1 = arith.truncf %0 : vector<8x64xf32> to vector<8x64xbf16>
    %c0_1 = arith.constant 0 : index
    %c0_2 = arith.constant 0 : index
    %2 = vector.load %arg2[%c0_1, %c0_2] : memref<64x128xbf16, #tpu.memory_space<vmem>>, vector<64x128xbf16>
    %cst = arith.constant dense<0.000000e+00> : vector<8x128xf32>
    %3 = tpu.matmul %1, %2, %cst {dimension_numbers = #tpu.dot_dimension_numbers<[1], [0], [0], [1], [0, 0, 1, 1], [], []>} : vector<8x64xbf16>, vector<64x128xbf16>, vector<8x128xf32> -> vector<8x128xf32>
    %c0_3 = arith.constant 0 : index
    %c0_4 = arith.constant 0 : index
    %4 = vector.load %arg6[%c0_3, %c0_4] : memref<8x128xf32, #tpu.memory_space<vmem>>, vector<1x128xf32>
    %5 = vector.broadcast %4 : vector<1x128xf32> to vector<8x128xf32>
    %6 = arith.addf %3, %5 : vector<8x128xf32>
    %cst_5 = arith.constant 0.000000e+00 : f32
    %7 = vector.broadcast %cst_5 : f32 to vector<8x128xf32>
    %8 = arith.maximumf %6, %7 : vector<8x128xf32>
    %9 = arith.truncf %8 : vector<8x128xf32> to vector<8x128xbf16>
    %c0_6 = arith.constant 0 : index
    %c0_7 = arith.constant 0 : index
    %10 = vector.load %arg3[%c0_6, %c0_7] : memref<128x128xbf16, #tpu.memory_space<vmem>>, vector<128x128xbf16>
    %cst_8 = arith.constant dense<0.000000e+00> : vector<8x128xf32>
    %11 = tpu.matmul %9, %10, %cst_8 {dimension_numbers = #tpu.dot_dimension_numbers<[1], [0], [0], [1], [0, 0, 1, 1], [], []>} : vector<8x128xbf16>, vector<128x128xbf16>, vector<8x128xf32> -> vector<8x128xf32>
    %c1 = arith.constant 1 : index
    %c0_9 = arith.constant 0 : index
    %12 = vector.load %arg6[%c1, %c0_9] : memref<8x128xf32, #tpu.memory_space<vmem>>, vector<1x128xf32>
    %13 = vector.broadcast %12 : vector<1x128xf32> to vector<8x128xf32>
    %14 = arith.addf %11, %13 : vector<8x128xf32>
    %cst_10 = arith.constant 0.000000e+00 : f32
    %15 = vector.broadcast %cst_10 : f32 to vector<8x128xf32>
    %16 = arith.maximumf %14, %15 : vector<8x128xf32>
    %17 = arith.truncf %16 : vector<8x128xf32> to vector<8x128xbf16>
    %c0_11 = arith.constant 0 : index
    %c0_12 = arith.constant 0 : index
    %18 = vector.load %arg4[%c0_11, %c0_12] : memref<128x128xbf16, #tpu.memory_space<vmem>>, vector<128x128xbf16>
    %cst_13 = arith.constant dense<0.000000e+00> : vector<8x128xf32>
    %19 = tpu.matmul %17, %18, %cst_13 {dimension_numbers = #tpu.dot_dimension_numbers<[1], [0], [0], [1], [0, 0, 1, 1], [], []>} : vector<8x128xbf16>, vector<128x128xbf16>, vector<8x128xf32> -> vector<8x128xf32>
    %c2 = arith.constant 2 : index
    %c0_14 = arith.constant 0 : index
    %20 = vector.load %arg6[%c2, %c0_14] : memref<8x128xf32, #tpu.memory_space<vmem>>, vector<1x128xf32>
    %21 = vector.broadcast %20 : vector<1x128xf32> to vector<8x128xf32>
    %22 = arith.addf %19, %21 : vector<8x128xf32>
    %cst_15 = arith.constant 0.000000e+00 : f32
    %23 = vector.broadcast %cst_15 : f32 to vector<8x128xf32>
    %24 = arith.maximumf %22, %23 : vector<8x128xf32>
    %25 = arith.truncf %24 : vector<8x128xf32> to vector<8x128xbf16>
    %c0_16 = arith.constant 0 : index
    %c0_17 = arith.constant 0 : index
    %26 = vector.load %arg5[%c0_16, %c0_17] : memref<128x128xbf16, #tpu.memory_space<vmem>>, vector<128x128xbf16>
    %cst_18 = arith.constant dense<0.000000e+00> : vector<8x128xf32>
    %27 = tpu.matmul %25, %26, %cst_18 {dimension_numbers = #tpu.dot_dimension_numbers<[1], [0], [0], [1], [0, 0, 1, 1], [], []>} : vector<8x128xbf16>, vector<128x128xbf16>, vector<8x128xf32> -> vector<8x128xf32>
    %c3 = arith.constant 3 : index
    %c0_19 = arith.constant 0 : index
    %28 = vector.load %arg6[%c3, %c0_19] : memref<8x128xf32, #tpu.memory_space<vmem>>, vector<1x128xf32>
    %29 = vector.broadcast %28 : vector<1x128xf32> to vector<8x128xf32>
    %30 = arith.addf %27, %29 : vector<8x128xf32>
    %cst_20 = arith.constant 0.000000e+00 : f32
    %31 = vector.broadcast %cst_20 : f32 to vector<8x128xf32>
    %32 = arith.maximumf %30, %31 : vector<8x128xf32>
    %33 = arith.truncf %32 : vector<8x128xf32> to vector<8x128xbf16>
    %c0_21 = arith.constant 0 : index
    %c0_22 = arith.constant 0 : index
    %34 = vector.load %arg7[%c0_21, %c0_22] : memref<8x128xbf16, #tpu.memory_space<vmem>>, vector<8x128xbf16>
    tpu.vector_store %arg7[%c0_21, %c0_22], %33 {strides = array<i32>} : memref<8x128xbf16, #tpu.memory_space<vmem>>, vector<8x128xbf16>,
    return
  }
  func.func @transform_0(%arg0: i32) -> (i32, i32) {
    %c0_i32 = arith.constant 0 : i32
    %c0_i32_0 = arith.constant 0 : i32
    return %arg0, %c0_i32 : i32, i32
  }
  func.func @transform_1(%arg0: i32) -> (i32, i32) {
    %c0_i32 = arith.constant 0 : i32
    %c0_i32_0 = arith.constant 0 : i32
    %c0_i32_1 = arith.constant 0 : i32
    return %c0_i32, %c0_i32_0 : i32, i32
  }
  func.func @transform_2(%arg0: i32) -> (i32, i32) {
    %c0_i32 = arith.constant 0 : i32
    %c0_i32_0 = arith.constant 0 : i32
    %c0_i32_1 = arith.constant 0 : i32
    return %c0_i32, %c0_i32_0 : i32, i32
  }
  func.func @transform_3(%arg0: i32) -> (i32, i32) {
    %c0_i32 = arith.constant 0 : i32
    %c0_i32_0 = arith.constant 0 : i32
    %c0_i32_1 = arith.constant 0 : i32
    return %c0_i32, %c0_i32_0 : i32, i32
  }
  func.func @transform_4(%arg0: i32) -> (i32, i32) {
    %c0_i32 = arith.constant 0 : i32
    %c0_i32_0 = arith.constant 0 : i32
    %c0_i32_1 = arith.constant 0 : i32
    return %c0_i32, %c0_i32_0 : i32, i32
  }
  func.func @transform_5(%arg0: i32) -> (i32, i32) {
    %c0_i32 = arith.constant 0 : i32
    %c0_i32_0 = arith.constant 0 : i32
    %c0_i32_1 = arith.constant 0 : i32
    return %c0_i32, %c0_i32_0 : i32, i32
  }
  func.func @transform_6(%arg0: i32) -> (i32, i32) {
    %c0_i32 = arith.constant 0 : i32
    %c0_i32_0 = arith.constant 0 : i32
    return %arg0, %c0_i32 : i32, i32
  }
}

</mosaic_0001>

<bundles_post_ra>
// kernel: tpu_custom_call.1
= control target key start
LH: loop header
LB: loop body
LE: loop exit
PB: predicated region body
PF: predicated region fallthrough
CT: control target
= control target key end

     0   :  { %11 = vsyncpa [#allocation3], 0  ;;  %s953_s0 = inlined_call_operand.hbm [shape: f32[8,64], index: 0, kind: input, shape index: {}]   ;;  %s954_s1 = inlined_call_operand.hbm [shape: bf16[64,128], index: 1, kind: input, shape index: {}]   ;;  %s955_s2 = inlined_call_operand.hbm [shape: bf16[128,128], index: 2, kind: input, shape index: {}]   ;;  %s956_s3 = inlined_call_operand.hbm [shape: bf16[128,128], index: 3, kind: input, shape index: {}]   ;;  %s957_s4 = inlined_call_operand.hbm [shape: bf16[128,128], index: 4, kind: input, shape index: {}]   ;;  %s958_s5 = inlined_call_operand.vmem [shape: f32[8,128], index: 5, kind: input, shape index: {}]   ;;  %s959_s6 = inlined_call_operand.hbm [shape: bf16[8,128], index: 6, kind: output, shape index: {}]  }
   0x1   :  { %12 = vsyncpa [#allocation6], 0 }
   0x2   :  { %13 = vsyncpa [#allocation9], 0 }
   0x3   :  { %14 = vsyncpa [#allocation4], 0  ;;  %s830_s21 = smov [#allocation5]  }
   0x4   :  { %s30_s22 = sshll.u32 %s830_s21, 4  ;;  %s31_s22 = int_to_ptr.vmem [resolvable:$true] %s30_s22 }
   0x5   :  { %s710_s23 = scalar_lea.vmem %s31_s22, 512  ;;  %p715_p1 = scmp.lt.s32.totalorder %s31_s22, %s31_s22 }
   0x6   :  { %p711_p0 = scmp.ne.s32.totalorder %s31_s22, %s710_s23  ;;  %p716_p2 = scmp.lt.s32.totalorder %s710_s23, %s710_s23 }
   0x8   :  { %p717_p3 = por %p716_p2, %p715_p1 }
   0xa   :  { %p718_p4 = pnand %p717_p3, %p711_p0 }
   0xc   :  { %721 = shalt.err (!%p718_p4)
}
   0xd   :  { %s831_s24 = smov 64   ;;  %s832_s25 = smov 4  }
   0xe   :  { %36 = dma.hbm_to_vmem [thread:$0]  %s954_s1, 512, %s31_s22, [#allocation6], %s831_s24, %s831_s24, %s832_s25  }
   0xf   :  { %s833_s28 = smov [#allocation8]   ;;  %s834_s30 = smov [#allocation2]  }
  0x10   :  { %s54_s29 = sshll.u32 %s833_s28, 4  ;;  %s21_s7 = sshll.u32 %s834_s30, 4  ;;  %s55_s29 = int_to_ptr.vmem [resolvable:$true] %s54_s29  ;;  %s22_s7 = int_to_ptr.vmem [resolvable:$true] %s21_s7 }
  0x11   :  { %s730_s8 = scalar_lea.vmem %s55_s29, 1024  ;;  %p735_p6 = scmp.lt.s32.totalorder %s55_s29, %s55_s29 }
  0x12   :  { %p731_p5 = scmp.ne.s32.totalorder %s55_s29, %s730_s8  ;;  %p736_p7 = scmp.lt.s32.totalorder %s730_s8, %s730_s8 }
  0x14   :  { %p737_p8 = por %p736_p7, %p735_p6 }
  0x16   :  { %p738_p9 = pnand %p737_p8, %p731_p5 }
  0x18   :  { %741 = shalt.err (!%p738_p9)
}
  0x19   :  { %60 = dma.hbm_to_vmem [thread:$0]  %s956_s3, 1024, %s55_s29, [#allocation9], %s831_s24, %s831_s24, %s832_s25  }
  0x1a   :  { %s750_s1 = scalar_lea.vmem %s22_s7, 128  ;;  %p755_p11 = scmp.lt.s32.totalorder %s22_s7, %s22_s7 }
  0x1b   :  { %p751_p10 = scmp.ne.s32.totalorder %s22_s7, %s750_s1  ;;  %p756_p12 = scmp.lt.s32.totalorder %s750_s1, %s750_s1 }
  0x1d   :  { %p757_p13 = por %p756_p12, %p755_p11 }
  0x1f   :  { %p758_p0 = pnand %p757_p13, %p751_p10 }
  0x21   :  { %761 = shalt.err (!%p758_p0)
}
  0x22   :  { %24 = dma.hbm_to_vmem [thread:$0]  %s953_s0, 128, %s22_s7, [#allocation3]  }
  0x23   :  { %s835_s13 = smov [#allocation7]   ;;  %s836_s15 = smov [#allocation10]  }
  0x24   :  { %s42_s14 = sshll.u32 %s835_s13, 4  ;;  %s66_s16 = sshll.u32 %s836_s15, 4  ;;  %s43_s14 = int_to_ptr.vmem [resolvable:$true] %s42_s14  ;;  %s67_s16 = int_to_ptr.vmem [resolvable:$true] %s66_s16 }
  0x25   :  { %s770_s17 = scalar_lea.vmem %s43_s14, 1024  ;;  %p775_p2 = scmp.lt.s32.totalorder %s43_s14, %s43_s14 }
  0x26   :  { %p771_p1 = scmp.ne.s32.totalorder %s43_s14, %s770_s17  ;;  %p776_p3 = scmp.lt.s32.totalorder %s770_s17, %s770_s17 }
  0x28   :  { %p777_p4 = por %p776_p3, %p775_p2 }
  0x2a   :  { %p778_p5 = pnand %p777_p4, %p771_p1 }
  0x2c   :  { %781 = shalt.err (!%p778_p5)
}
  0x2d   :  { %48 = dma.hbm_to_vmem [thread:$0]  %s955_s2, 1024, %s43_s14, [#allocation6], %s831_s24, %s831_s24, %s832_s25  }
  0x2e   :  { %s790_s0 = scalar_lea.vmem %s67_s16, 1024  ;;  %p795_p7 = scmp.lt.s32.totalorder %s67_s16, %s67_s16 }
  0x2f   :  { %p791_p6 = scmp.ne.s32.totalorder %s67_s16, %s790_s0  ;;  %p796_p8 = scmp.lt.s32.totalorder %s790_s0, %s790_s0 }
  0x31   :  { %p797_p9 = por %p796_p8, %p795_p7 }
  0x33   :  { %p798_p10 = pnand %p797_p9, %p791_p6 }
  0x35   :  { %801 = shalt.err (!%p798_p10)
}
  0x36   :  { %72 = dma.hbm_to_vmem [thread:$0]  %s957_s4, 1024, %s67_s16, [#allocation9], %s831_s24, %s831_s24, %s832_s25  }
  0x37   :  { %822 = dma.done.wait [#allocation3], 128  }
  0x38   :  { %823 = vsyncadd [#allocation3], 4294967168 }
  0x39   :  { %824 = dma.done.wait [#allocation6], 1536  }
  0x3a   :  { %825 = vsyncadd [#allocation6], 4294965760 }
  0x3b   :  { %826 = dma.done.wait [#allocation9], 2048  }
  0x3c   :  { %827 = vsyncadd [#allocation9], 4294965248  ;;  %v837_v0 = vmov 0.0   ;;  %vm838_vm0 = vmmov 0   ;;  %v674_v1 = vld [vmem:[#allocation5 + $0x18] sm:$0xff]   ;;  %v675_v2 = vld [vmem:[#allocation5 + $0x10] sm:$0xff]  }
  0x3d   :  { %592 = vmatprep.subr.bf16.mxu0 %v837_v0  ;;  %600 = vmatprep.mubr.msk.bf16.mxu0 %vm838_vm0, %v837_v0  ;;  %v678_v3 = vld [vmem:[#allocation7 + $0x38] sm:$0xff]   ;;  %v676_v4 = vld [vmem:[#allocation5 + $0x8] sm:$0xff]   ;;  %v679_v5 = vld [vmem:[#allocation7 + $0x30] sm:$0xff]   ;;  %vm130_vm1 = vcmask 523264   ;;  %s839_s27 = smov [#allocation11]  }
  0x3e   :  { %604 = vmatprep.subr.bf16.mxu1 %v837_v0  ;;  %620 = vmatprep.mubr.msk.bf16.mxu1 %vm838_vm0, %v837_v0  ;;  %v677_v6 = vld [vmem:[#allocation5] sm:$0xff]   ;;  %v91_v7 = vld [vmem:[#allocation2] sm:$0xff]  ;;  %v680_v8 = vld [vmem:[#allocation7 + $0x28] sm:$0xff]   ;;  %s516_s28 = sshll.u32 %s839_s27, 4  ;;  %s517_s28 = int_to_ptr.vmem [resolvable:$true] %s516_s28 }
  0x3f   :  { %593 = vmatpush3.bf16.msra.mxu0 %v674_v1  ;;  %605 = vmatpush3.bf16.msra.mxu1 %v678_v3  ;;  %v92_v9 = vpack.c.bf16 %v91_v7, %v91_v7  ;;  %v681_v10 = vld [vmem:[#allocation7 + $0x20] sm:$0xff]   ;;  %v682_v11 = vld [vmem:[#allocation7 + $0x18] sm:$0xff]   ;;  %v683_v12 = vld [vmem:[#allocation7 + $0x10] sm:$0xff]   ;;  %s802_s29 = scalar_lea.vmem %s517_s28, 64  ;;  %p807_p12 = scmp.lt.s32.totalorder %s517_s28, %s517_s28 }
  0x40   :  { %594 = vmatprep.subr.bf16.mxu0 %v837_v0  ;;  %606 = vmatprep.subr.bf16.mxu1 %v837_v0  ;;  %v684_v13 = vld [vmem:[#allocation7 + $0x8] sm:$0xff]   ;;  %v685_v14 = vld [vmem:[#allocation7] sm:$0xff]   ;;  %v686_v15 = vld [vmem:[#allocation8 + $0x38] sm:$0xff]   ;;  %p803_p11 = scmp.ne.s32.totalorder %s517_s28, %s802_s29  ;;  %p808_p13 = scmp.lt.s32.totalorder %s802_s29, %s802_s29 }
  0x41   :  { %v687_v16 = vld [vmem:[#allocation8 + $0x30] sm:$0xff]   ;;  %v688_v17 = vld [vmem:[#allocation8 + $0x28] sm:$0xff]   ;;  %v689_v18 = vld [vmem:[#allocation8 + $0x20] sm:$0xff]  }
  0x42   :  { %v690_v19 = vld [vmem:[#allocation8 + $0x18] sm:$0xff]   ;;  %v691_v20 = vld [vmem:[#allocation8 + $0x10] sm:$0xff]   ;;  %v692_v29 = vld [vmem:[#allocation8 + $0x8] sm:$0xff]   ;;  %p809_p0 = por %p808_p13, %p807_p12 }
  0x43   :  { %595 = vmatpush3.bf16.msra.mxu0 %v675_v2  ;;  %607 = vmatpush3.bf16.msra.mxu1 %v679_v5  ;;  %v527_v21 = vld [vmem:[%s958_s5] ss:$0 sm:$0xff]  ;;  %v693_v30 = vld [vmem:[#allocation8] sm:$0xff]   ;;  %v695_v32 = vld [vmem:[#allocation10 + $0x30] sm:$0xff]  }
  0x44   :  { %596 = vmatprep.subr.bf16.mxu0 %v837_v0  ;;  %608 = vmatprep.subr.bf16.mxu1 %v837_v0  ;;  %v694_v31 = vld [vmem:[#allocation10 + $0x38] sm:$0xff]   ;;  %v696_v33 = vld [vmem:[#allocation10 + $0x28] sm:$0xff]   ;;  %v697_v34 = vld [vmem:[#allocation10 + $0x20] sm:$0xff]   ;;  %p810_p1 = pnand %p809_p0, %p803_p11 }
  0x45   :  { %v698_v35 = vld [vmem:[#allocation10 + $0x18] sm:$0xff]   ;;  %v699_v36 = vld [vmem:[#allocation10 + $0x10] sm:$0xff]   ;;  %v700_v45 = vld [vmem:[#allocation10 + $0x8] sm:$0xff]  }
  0x46   :  { %v533_v37 = vld [vmem:[%s958_s5 + $0x1] ss:$0 sm:$0xff]  ;;  %v701_v46 = vld [vmem:[#allocation10] sm:$0xff]   ;;  %v542_v47 = vld [vmem:[%s958_s5 + $0x2] ss:$0 sm:$0xff] }
  0x47   :  { %597 = vmatpush3.bf16.msra.mxu0 %v676_v4  ;;  %609 = vmatpush3.bf16.msra.mxu1 %v680_v8  ;;  %v551_v55 = vld [vmem:[%s958_s5 + $0x3] ss:$0 sm:$0xff] }
  0x48   :  { %598 = vmatprep.subr.bf16.mxu0 %v837_v0  ;;  %610 = vmatprep.subr.bf16.mxu1 %v837_v0 }
  0x4b   :  { %599 = vmatpush3.bf16.msra.mxu0 %v677_v6  ;;  %611 = vmatpush3.bf16.msra.mxu1 %v681_v10 }
  0x4c   :  { %624 = vmatprep.subr.bf16.mxu0 %v837_v0  ;;  %612 = vmatprep.subr.bf16.mxu1 %v837_v0 }
  0x4e   :  { %601 = vmatmul.mubr.msk.bf16.vlgmr.msra.gmra.mxu0 %vm130_vm1, %v92_v9 }
  0x4f   :  { %640 = vmatprep.mubr.msk.bf16.mxu0 %vm838_vm0, %v837_v0  ;;  %613 = vmatpush3.bf16.msra.mxu1 %v682_v11 }
  0x50   :  { %614 = vmatprep.subr.bf16.mxu1 %v837_v0  ;;  %625 = vmatpush3.bf16.msra.mxu0 %v686_v15 }
  0x51   :  { %626 = vmatprep.subr.bf16.mxu0 %v837_v0 }
  0x53   :  { %615 = vmatpush3.bf16.msra.mxu1 %v683_v12 }
  0x54   :  { %616 = vmatprep.subr.bf16.mxu1 %v837_v0  ;;  %627 = vmatpush3.bf16.msra.mxu0 %v687_v16 }
  0x55   :  { %628 = vmatprep.subr.bf16.mxu0 %v837_v0 }
  0x57   :  { %617 = vmatpush3.bf16.msra.mxu1 %v684_v13 }
  0x58   :  { %618 = vmatprep.subr.bf16.mxu1 %v837_v0  ;;  %629 = vmatpush3.bf16.msra.mxu0 %v688_v17 }
  0x59   :  { %630 = vmatprep.subr.bf16.mxu0 %v837_v0 }
  0x5b   :  { %619 = vmatpush3.bf16.msra.mxu1 %v685_v14 }
  0x5c   :  { %644 = vmatprep.subr.bf16.mxu1 %v837_v0  ;;  %631 = vmatpush3.bf16.msra.mxu0 %v689_v18 }
  0x5d   :  { %632 = vmatprep.subr.bf16.mxu0 %v837_v0 }
  0x60   :  { %633 = vmatpush3.bf16.msra.mxu0 %v690_v19 }
  0x61   :  { %634 = vmatprep.subr.bf16.mxu0 %v837_v0 }
  0x64   :  { %635 = vmatpush3.bf16.msra.mxu0 %v691_v20 }
  0x65   :  { %636 = vmatprep.subr.bf16.mxu0 %v837_v0 }
  0x68   :  { %637 = vmatpush3.bf16.msra.mxu0 %v692_v29 }
  0x69   :  { %638 = vmatprep.subr.bf16.mxu0 %v837_v0 }
  0x6c   :  { %639 = vmatpush3.bf16.msra.mxu0 %v693_v30 }
 0x10e   :  { %v168_v22 = vpop.f32.mrf.mxu0 }
 0x10f   :  { %v169_v23 = vadd.f32 %v527_v21, %v168_v22 }
 0x110   :  { %v602_v24 = vpop.f32.mrf.mxu0 }
 0x111   :  { %v174_v25 = vmax.f32 %v169_v23, 0.0 }
 0x112   :  { %v171_v26 = vpop.f32.mrf.mxu0 }
 0x113   :  { %v175_v27 = vpack.c.bf16 %v174_v25, %v174_v25 }
 0x114   :  { %v603_v28 = vpop.f32.mrf.mxu0 }
 0x115   :  { %621 = vmatmul.mubr.bf16.vlgmr.msra.gmra.mxu1 %v175_v27 }
 0x116   :  { %660 = vmatprep.mubr.msk.bf16.mxu1 %vm838_vm0, %v837_v0  ;;  %645 = vmatpush3.bf16.msra.mxu1 %v694_v31 }
 0x117   :  { %646 = vmatprep.subr.bf16.mxu1 %v837_v0 }
 0x11a   :  { %647 = vmatpush3.bf16.msra.mxu1 %v695_v32 }
 0x11b   :  { %648 = vmatprep.subr.bf16.mxu1 %v837_v0 }
 0x11e   :  { %649 = vmatpush3.bf16.msra.mxu1 %v696_v33 }
 0x11f   :  { %650 = vmatprep.subr.bf16.mxu1 %v837_v0 }
 0x122   :  { %651 = vmatpush3.bf16.msra.mxu1 %v697_v34 }
 0x123   :  { %652 = vmatprep.subr.bf16.mxu1 %v837_v0 }
 0x126   :  { %653 = vmatpush3.bf16.msra.mxu1 %v698_v35 }
 0x127   :  { %654 = vmatprep.subr.bf16.mxu1 %v837_v0 }
 0x12a   :  { %655 = vmatpush3.bf16.msra.mxu1 %v699_v36 }
 0x12b   :  { %656 = vmatprep.subr.bf16.mxu1 %v837_v0 }
 0x12e   :  { %657 = vmatpush3.bf16.msra.mxu1 %v700_v45 }
 0x12f   :  { %658 = vmatprep.subr.bf16.mxu1 %v837_v0 }
 0x132   :  { %659 = vmatpush3.bf16.msra.mxu1 %v701_v46 }
 0x1d5   :  { %v279_v38 = vpop.f32.mrf.mxu1 }
 0x1d6   :  { %v280_v39 = vadd.f32 %v533_v37, %v279_v38 }
 0x1d7   :  { %v622_v40 = vpop.f32.mrf.mxu1 }
 0x1d8   :  { %v285_v41 = vmax.f32 %v280_v39, 0.0 }
 0x1d9   :  { %v282_v42 = vpop.f32.mrf.mxu1 }
 0x1da   :  { %v286_v43 = vpack.c.bf16 %v285_v41, %v285_v41 }
 0x1db   :  { %v623_v44 = vpop.f32.mrf.mxu1 }
 0x1dc   :  { %641 = vmatmul.mubr.bf16.vlgmr.msra.gmra.mxu0 %v286_v43 }
 0x29c   :  { %v390_v48 = vpop.f32.mrf.mxu0 }
 0x29d   :  { %v391_v49 = vadd.f32 %v542_v47, %v390_v48 }
 0x29e   :  { %v642_v50 = vpop.f32.mrf.mxu0 }
 0x29f   :  { %v396_v51 = vmax.f32 %v391_v49, 0.0 }
 0x2a0   :  { %v393_v52 = vpop.f32.mrf.mxu0 }
 0x2a1   :  { %v397_v53 = vpack.c.bf16 %v396_v51, %v396_v51 }
 0x2a2   :  { %v643_v54 = vpop.f32.mrf.mxu0 }
 0x2a3   :  { %661 = vmatmul.mubr.bf16.vlgmr.msra.gmra.mxu1 %v397_v53 }
 0x363   :  { %v501_v56 = vpop.f32.mrf.mxu1 }
 0x364   :  { %v502_v57 = vadd.f32 %v551_v55, %v501_v56 }
 0x365   :  { %v662_v58 = vpop.f32.mrf.mxu1 }
 0x366   :  { %v507_v59 = vmax.f32 %v502_v57, 0.0 }
 0x367   :  { %v504_v60 = vpop.f32.mrf.mxu1 }
 0x368   :  { %v508_v61 = vpack.c.bf16 %v507_v59, %v507_v59 }
 0x369   :  { %v663_v62 = vpop.f32.mrf.mxu1 }
 0x36a   :  { %509 = vst [vmem:[#allocation11] sm:$0xf] %v508_v61 }
 0x36b   :  { %813 = shalt.err (!%p810_p1)
}
 0x36c   :  { %519 = dma.vmem_to_hbm [thread:$0]  %s517_s28, 64, %s959_s6, [#allocation4]  }
 0x36d   :  { %828 = dma.done.wait [#allocation4], 64  }
 0x36e   :  { %829 = vsyncadd [#allocation4], 4294967232 }
 0x36f   :  { %523 = vsyncpa [#allocation3], 1 }
 0x370   :  { %524 = vsyncpa [#allocation6], 1 }
 0x371   :  { %525 = vsyncpa [#allocation9], 1 }
 0x372   :  { %526 = vsyncpa [#allocation4], 1 }

</bundles_post_ra>
